<compile_context>
chip_gen: v6e
topology: v6e:2x2x1
jax: 0.10.0
libtpu: 0.0.40
codegen_flags: <defaults>
</compile_context>

<pallas_src>
import functools

import jax
import jax.numpy as jnp
from jax.experimental import pallas as pl
from jax.experimental.pallas import tpu as pltpu


def _generic_basis_kernel(theta_ref, back_ref, fore_ref, *,
                          backcast_size: int, forecast_size: int,
                          theta_dim: int):
    """Split one (tb, theta_dim) row tile into backcast / forecast blocks."""
    t = theta_ref[...]
    back_ref[...] = t[:, :backcast_size]
    fore_ref[...] = t[:, theta_dim - forecast_size:]


def _padded_cols(n: int) -> int:
    """Columns actually occupied in VMEM (lane-padded to 128)."""
    return pl.cdiv(n, 128) * 128


def _choose_block_rows(batch: int, backcast_size: int, forecast_size: int,
                       theta_dim: int, itemsize: int) -> int:
    # Lane-padding-aware per-row VMEM footprint, x2 for double buffering of
    # the theta input block and both output blocks.
    per_row = 2 * itemsize * (_padded_cols(theta_dim)
                              + _padded_cols(backcast_size)
                              + _padded_cols(forecast_size))
    budget = 24 * 1024 * 1024  # fits v7x's 32 MiB scoped / 64 MiB physical VMEM
    tb = max(8, budget // per_row)
    tb = min(tb, 8192)         # v7x-safe upper bound; already amortizes step cost
    tb = (tb // 8) * 8         # sublane-aligned row tiles

    # For big batches, keep >= 4 grid steps so the "parallel" batch axis can
    # actually shard across both v7x TensorCores.
    quarter = pl.cdiv(batch, 4)
    quarter_aligned = pl.cdiv(quarter, 8) * 8
    if quarter_aligned >= 1024:
        tb = min(tb, quarter_aligned)

    tb = min(tb, batch)
    return max(1, tb)


def generic_basis(theta: jax.Array, backcast_size: int, forecast_size: int,
                  *, block_rows: int | None = None):
    """Pallas implementation of GenericBasis.forward.

    theta: [batch, theta_dim] with theta_dim >= max(backcast_size, forecast_size).
    Returns (backcast [batch, backcast_size], forecast [batch, forecast_size]).
    """
    batch, theta_dim = theta.shape
    assert theta_dim >= backcast_size and theta_dim >= forecast_size

    itemsize = jnp.dtype(theta.dtype).itemsize
    tb = block_rows if block_rows is not None else _choose_block_rows(
        batch, backcast_size, forecast_size, theta_dim, itemsize)
    tb = max(1, min(tb, batch))
    num_blocks = pl.cdiv(batch, tb)

    kernel = functools.partial(
        _generic_basis_kernel,
        backcast_size=backcast_size, forecast_size=forecast_size,
        theta_dim=theta_dim)

    out_shapes = (
        jax.ShapeDtypeStruct((batch, backcast_size), theta.dtype),
        jax.ShapeDtypeStruct((batch, forecast_size), theta.dtype),
    )

    # Pure memory op: full contiguous read of theta + writes of both slices.
    bytes_accessed = (batch * theta_dim
                      + batch * (backcast_size + forecast_size)) * itemsize

    # Scoped-VMEM limit: enough for the lane-padded, double-buffered tiles on
    # every generation (v5e default is only 16 MiB), within v7x's 64 MiB part.
    vmem_limit = 32 * 1024 * 1024

    return pl.pallas_call(
        kernel,
        out_shape=out_shapes,
        grid_spec=pltpu.PrefetchScalarGridSpec(
            num_scalar_prefetch=0,
            grid=(num_blocks,),
            in_specs=[pl.BlockSpec((tb, theta_dim), lambda i: (i, 0))],
            out_specs=(pl.BlockSpec((tb, backcast_size), lambda i: (i, 0)),
                       pl.BlockSpec((tb, forecast_size), lambda i: (i, 0))),
        ),
        compiler_params=pltpu.CompilerParams(
            dimension_semantics=("parallel",),
            vmem_limit_bytes=vmem_limit),
        cost_estimate=pl.CostEstimate(
            flops=0, transcendentals=0, bytes_accessed=bytes_accessed),
    )(theta)


if __name__ == "__main__":
    # In N-BEATS the generic block produces theta of size
    # backcast_size + forecast_size; pick small, representative sizes.
    backcast_size = 96
    forecast_size = 24
    theta_dim = backcast_size + forecast_size

    key = jax.random.PRNGKey(0)

    # Case 1: divisible batch, auto-chosen tile.
    batch = 8
    theta = jax.random.normal(key, (batch, theta_dim), dtype=jnp.float32)
    backcast, forecast = generic_basis(theta, backcast_size, forecast_size)
    jax.block_until_ready((backcast, forecast))
    assert backcast.shape == (batch, backcast_size)
    assert forecast.shape == (batch, forecast_size)
    assert jnp.array_equal(backcast, theta[:, :backcast_size])
    assert jnp.array_equal(forecast, theta[:, -forecast_size:])

    # Case 2: non-divisible batch with a tail that is not a multiple of 8,
    # forcing a partial last output block (exercises OOB-row clipping).
    batch2 = 13
    theta2 = jax.random.normal(jax.random.PRNGKey(1), (batch2, theta_dim),
                               dtype=jnp.float32)
    backcast2, forecast2 = generic_basis(theta2, backcast_size, forecast_size,
                                         block_rows=8)
    jax.block_until_ready((backcast2, forecast2))
    assert backcast2.shape == (batch2, backcast_size)
    assert forecast2.shape == (batch2, forecast_size)
    assert jnp.array_equal(backcast2, theta2[:, :backcast_size])
    assert jnp.array_equal(forecast2, theta2[:, -forecast_size:])

    print("KERNEL_OK")
</pallas_src>

<mosaic_0001>
module attributes {stable_mosaic.version = 11 : i64} {
  func.func @_generic_basis_kernel(%arg0: i32, %arg1: memref<8x120xf32, #tpu.memory_space<vmem>>, %arg2: memref<8x96xf32, #tpu.memory_space<vmem>>, %arg3: memref<8x24xf32, #tpu.memory_space<vmem>>) attributes {dimension_semantics = [#tpu.dimension_semantics<parallel>], iteration_bounds = array<i64: 1>, scalar_prefetch = 0 : i64, scratch_operands = 0 : i64, tpu.core_type = #tpu.core_type<tc>, window_params = [{transform_indices = @transform_0, window_bounds = array<i64: 8, 120>}, {transform_indices = @transform_1, window_bounds = array<i64: 8, 96>}, {transform_indices = @transform_2, window_bounds = array<i64: 8, 24>}]} {
    %c0 = arith.constant 0 : index
    %c0_0 = arith.constant 0 : index
    %0 = vector.load %arg1[%c0, %c0_0] : memref<8x120xf32, #tpu.memory_space<vmem>>, vector<8x120xf32>
    %1 = vector.extract_strided_slice %0 {offsets = [0, 0], sizes = [8, 96], strides = [1, 1]} : vector<8x120xf32> to vector<8x96xf32>
    %c0_1 = arith.constant 0 : index
    %c0_2 = arith.constant 0 : index
    %2 = vector.load %arg2[%c0_1, %c0_2] : memref<8x96xf32, #tpu.memory_space<vmem>>, vector<8x96xf32>
    tpu.vector_store %arg2[%c0_1, %c0_2], %1 {strides = array<i32>} : memref<8x96xf32, #tpu.memory_space<vmem>>, vector<8x96xf32>,
    %3 = vector.extract_strided_slice %0 {offsets = [0, 96], sizes = [8, 24], strides = [1, 1]} : vector<8x120xf32> to vector<8x24xf32>
    %c0_3 = arith.constant 0 : index
    %c0_4 = arith.constant 0 : index
    %4 = vector.load %arg3[%c0_3, %c0_4] : memref<8x24xf32, #tpu.memory_space<vmem>>, vector<8x24xf32>
    tpu.vector_store %arg3[%c0_3, %c0_4], %3 {strides = array<i32>} : memref<8x24xf32, #tpu.memory_space<vmem>>, vector<8x24xf32>,
    return
  }
  func.func @transform_0(%arg0: i32) -> (i32, i32) {
    %c0_i32 = arith.constant 0 : i32
    %c0_i32_0 = arith.constant 0 : i32
    return %arg0, %c0_i32 : i32, i32
  }
  func.func @transform_1(%arg0: i32) -> (i32, i32) {
    %c0_i32 = arith.constant 0 : i32
    %c0_i32_0 = arith.constant 0 : i32
    return %arg0, %c0_i32 : i32, i32
  }
  func.func @transform_2(%arg0: i32) -> (i32, i32) {
    %c0_i32 = arith.constant 0 : i32
    %c0_i32_0 = arith.constant 0 : i32
    return %arg0, %c0_i32 : i32, i32
  }
}

</mosaic_0001>

<bundles_post_ra>
// kernel: tpu_custom_call.1
= control target key start
LH: loop header
LB: loop body
LE: loop exit
PB: predicated region body
PF: predicated region fallthrough
CT: control target
= control target key end

     0   :  { %8 = vsyncpa [#allocation3], 0  ;;  %s160_s0 = inlined_call_operand.hbm [shape: f32[8,120], index: 0, kind: input, shape index: {}]   ;;  %s161_s1 = inlined_call_operand.hbm [shape: f32[8,96], index: 1, kind: output, shape index: {0}]   ;;  %s162_s2 = inlined_call_operand.hbm [shape: f32[8,24], index: 2, kind: output, shape index: {1}]  }
   0x1   :  { %9 = vsyncpa [#allocation4], 0 }
   0x2   :  { %10 = vsyncpa [#allocation7], 0  ;;  %s132_s9 = smov [#allocation2]  }
   0x3   :  { %s17_s10 = sshll.u32 %s132_s9, 4  ;;  %s18_s10 = int_to_ptr.vmem [resolvable:$true] %s17_s10 }
   0x4   :  { %s74_s11 = scalar_lea.vmem %s18_s10, 128  ;;  %p79_p1 = scmp.lt.s32.totalorder %s18_s10, %s18_s10 }
   0x5   :  { %p75_p0 = scmp.ne.s32.totalorder %s18_s10, %s74_s11  ;;  %p80_p2 = scmp.lt.s32.totalorder %s74_s11, %s74_s11 }
   0x7   :  { %p81_p3 = por %p80_p2, %p79_p1 }
   0x9   :  { %p82_p4 = pnand %p81_p3, %p75_p0 }
   0xb   :  { %85 = shalt.err (!%p82_p4)
}
   0xc   :  { %20 = dma.hbm_to_vmem [thread:$0]  %s160_s0, 128, %s18_s10, [#allocation3]  }
   0xd   :  { %126 = dma.done.wait [#allocation3], 128  }
   0xe   :  { %127 = vsyncadd [#allocation3], 4294967168  ;;  %s133_s14 = smov [#allocation5]   ;;  %vm25_vm0 = vcmask 785408   ;;  %v24_v0 = vld [vmem:[#allocation2] sm:$0xff]  ;;  %s134_s16 = smov 32  }
   0xf   :  { %s39_s15 = sshll.u32 %s133_s14, 4  ;;  %28 = vrot.lane.b32.xlu0 %v24_v0, %s134_s16  ;;  %26 = vst.msk [vmem:[#allocation5] sm:$0xff] %vm25_vm0, %v24_v0  ;;  %s40_s15 = int_to_ptr.vmem [resolvable:$true] %s39_s15 }
  0x10   :  { %s86_s17 = scalar_lea.vmem %s40_s15, 128  ;;  %p91_p6 = scmp.lt.s32.totalorder %s40_s15, %s40_s15 }
  0x11   :  { %p87_p5 = scmp.ne.s32.totalorder %s40_s15, %s86_s17  ;;  %p92_p7 = scmp.lt.s32.totalorder %s86_s17, %s86_s17 }
  0x13   :  { %p93_p8 = por %p92_p7, %p91_p6 }
  0x15   :  { %p94_p9 = pnand %p93_p8, %p87_p5 }
  0x17   :  { %97 = shalt.err (!%p94_p9)
}
  0x18   :  { %42 = dma.vmem_to_hbm [thread:$0]  %s40_s15, 128, %s161_s1, [#allocation4]   ;;  %vm31_vm1 = vcmask 195584  }
  0x19   :  { %s135_s0 = smov [#allocation6]  }
  0x1a   :  { %s49_s20 = sshll.u32 %s135_s0, 4  ;;  %s50_s20 = int_to_ptr.vmem [resolvable:$true] %s49_s20 }
  0x1b   :  { %s106_s21 = scalar_lea.vmem %s50_s20, 128  ;;  %p111_p11 = scmp.lt.s32.totalorder %s50_s20, %s50_s20 }
  0x1c   :  { %p107_p10 = scmp.ne.s32.totalorder %s50_s20, %s106_s21  ;;  %p112_p12 = scmp.lt.s32.totalorder %s106_s21, %s106_s21 }
  0x1e   :  { %p113_p13 = por %p112_p12, %p111_p11 }
  0x20   :  { %p114_p0 = pnand %p113_p13, %p107_p10 }
  0x81   :  { %v29_v1 = vpop.permute.xlu0 %28 }
  0x82   :  { %32 = vst.msk [vmem:[#allocation6] sm:$0xff] %vm31_vm1, %v29_v1 }
  0x83   :  { %117 = shalt.err (!%p114_p0)
}
  0x84   :  { %52 = dma.vmem_to_hbm [thread:$0]  %s50_s20, 128, %s162_s2, [#allocation7]  }
  0x85   :  { %128 = dma.done.wait [#allocation4], 128  }
  0x86   :  { %129 = vsyncadd [#allocation4], 4294967168 }
  0x87   :  { %130 = dma.done.wait [#allocation7], 128  }
  0x88   :  { %131 = vsyncadd [#allocation7], 4294967168 }
  0x89   :  { %59 = vsyncpa [#allocation3], 1 }
  0x8a   :  { %60 = vsyncpa [#allocation4], 1 }
  0x8b   :  { %61 = vsyncpa [#allocation7], 1 }

</bundles_post_ra>
